<compile_context>
chip_gen: v6e
topology: v6e:2x2x1
jax: 0.10.0
libtpu: 0.0.40
codegen_flags: <defaults>
</compile_context>

<pallas_src>
import functools

import jax
import jax.numpy as jnp
from jax import lax
from jax.experimental import pallas as pl
from jax.experimental.pallas import tpu as pltpu


# ----------------------------------------------------------------------------
# Tiling helpers
# ----------------------------------------------------------------------------
_MAX_TILE = 4096  # lanes; keeps double-buffered (1,C,TILE) tiles at a few MiB


def _round_up(x, m):
    return (x + m - 1) // m * m


def _tile_and_pad(n, max_tile=_MAX_TILE):
    """Pick a 128-multiple lane tile and the padded length it divides."""
    t = max(1, -(-n // max_tile))              # number of tiles
    while True:
        tile = _round_up(-(-n // t), 128)
        if tile <= max_tile or tile <= 128:
            return tile, t * tile
        t += 1


def _pad_last(x, n_pad):
    pad = n_pad - x.shape[-1]
    if pad == 0:
        return x
    return jnp.pad(x, ((0, 0),) * (x.ndim - 1) + ((0, pad),))


def _col(b):
    """(C,) bias -> (C, 1) column for lane broadcast inside the kernels."""
    return b.reshape(-1, 1)


def _cparams():
    # Both grid axes are embarrassingly parallel (per-image x per-lane-tile) so the
    # megacore / both v7x TCs can split either.  32 MiB scoped VMEM is plenty for the
    # few-MiB tiles and is safe on every generation (raises v5e's 16 MiB default,
    # stays under v7x's 64 MiB physical).
    return pltpu.CompilerParams(
        dimension_semantics=("parallel", "parallel"),
        vmem_limit_bytes=32 * 1024 * 1024)


# ----------------------------------------------------------------------------
# One-time probe: can Mosaic lower sin/cos inside a kernel?  (Fused path if yes.)
# ----------------------------------------------------------------------------
def _probe_trig_support():
    def k(x_ref, o_ref):
        o_ref[...] = jnp.cos(x_ref[...]) + jnp.sin(x_ref[...])
    try:
        jax.block_until_ready(
            pl.pallas_call(k, out_shape=jax.ShapeDtypeStruct((8, 128), jnp.float32))(
                jnp.ones((8, 128), jnp.float32)))
        return True
    except Exception:
        return False


FUSE_TRIG = _probe_trig_support()


# ----------------------------------------------------------------------------
# Pallas kernels (per grid step: one image's (C, TILE) lane tile)
# ----------------------------------------------------------------------------
def _pre_kernel(t2_ref, t1_ref, w1_ref, b1_ref, w2_ref, b2_ref, p2_ref, p1_ref):
    """pre1 / pre2 1x1 convs (+1e-8 as in the reference)."""
    t2 = t2_ref[0]                                    # (C, TILE)
    t1 = t1_ref[0]
    p2 = jnp.dot(w1_ref[...], t2, preferred_element_type=jnp.float32) + b1_ref[...] + 1e-8
    p1 = jnp.dot(w2_ref[...], t1, preferred_element_type=jnp.float32) + b2_ref[...] + 1e-8
    p2_ref[0] = p2.astype(p2_ref.dtype)
    p1_ref[0] = p1.astype(p1_ref.dtype)


def _freq_kernel(amp2_ref, pha2_ref, pha1_ref, a0_ref, a1_ref,
                 w_ref, b_ref, out0_ref, out1_ref, *, fuse_trig):
    """Phase mix (precomputed attention a0/a1) + amp_fuse / pha_fuse MLPs.

    If fuse_trig: emits real = amp_f*cos(pha_f)+2e-8, imag = amp_f*sin(pha_f)+1e-8.
    Otherwise emits amp_f, pha_f and the trig epilogue runs in XLA.
    """
    amp2 = amp2_ref[0].astype(jnp.float32)            # (C, TILE)
    pha2 = pha2_ref[0].astype(jnp.float32)
    pha1 = pha1_ref[0].astype(jnp.float32)
    a0 = a0_ref[0]                                    # (C, 1) f32 attention weights
    a1 = a1_ref[0]
    feats_v = a0 * pha2 + a1 * pha1

    def conv_lrelu_conv(x, w1, b1, w2, b2):
        h = jnp.dot(w1, x, preferred_element_type=jnp.float32) + b1
        h = jnp.where(h > 0, h, 0.1 * h)              # LeakyReLU(0.1)
        return jnp.dot(w2, h, preferred_element_type=jnp.float32) + b2

    amp_f = conv_lrelu_conv(amp2, w_ref[0], b_ref[0], w_ref[1], b_ref[1])
    pha_f = conv_lrelu_conv(feats_v, w_ref[2], b_ref[2], w_ref[3], b_ref[3])

    if fuse_trig:
        out0_ref[0] = (amp_f * jnp.cos(pha_f) + 2e-8).astype(out0_ref.dtype)   # real
        out1_ref[0] = (amp_f * jnp.sin(pha_f) + 1e-8).astype(out1_ref.dtype)   # imag
    else:
        out0_ref[0] = amp_f.astype(out0_ref.dtype)
        out1_ref[0] = pha_f.astype(out1_ref.dtype)


def _post_kernel(y_ref, w_ref, b_ref, o_ref):
    """abs(.) fused with the post 1x1 conv."""
    y = jnp.abs(y_ref[0])                             # (C, TILE)
    o = jnp.dot(w_ref[...], y, preferred_element_type=jnp.float32) + b_ref[...]
    o_ref[0] = o.astype(o_ref.dtype)


# ----------------------------------------------------------------------------
# pallas_call wrappers (grid = (B, lane_tiles), lane tiles are 128-multiples)
# ----------------------------------------------------------------------------
def _pre_pallas(t2, t1, params, tile):
    B, C, L = t2.shape
    nt = L // tile
    img = pl.BlockSpec((1, C, tile), lambda b, t: (b, 0, t))
    wsp = pl.BlockSpec((C, C), lambda b, t: (0, 0))
    bsp = pl.BlockSpec((C, 1), lambda b, t: (0, 0))
    grid_spec = pltpu.PrefetchScalarGridSpec(
        num_scalar_prefetch=0, grid=(B, nt),
        in_specs=[img, img, wsp, bsp, wsp, bsp],
        out_specs=[img, img])
    return pl.pallas_call(
        _pre_kernel,
        out_shape=[jax.ShapeDtypeStruct((B, C, L), jnp.float32)] * 2,
        grid_spec=grid_spec,
        compiler_params=_cparams(),
    )(t2, t1,
      params["w_pre1"], _col(params["b_pre1"]),
      params["w_pre2"], _col(params["b_pre2"]))


def _freq_pallas(amp2, pha2, pha1, a0, a1, params, tile):
    B, C, L = amp2.shape
    nt = L // tile
    img = pl.BlockSpec((1, C, tile), lambda b, t: (b, 0, t))
    att = pl.BlockSpec((1, C, 1), lambda b, t: (b, 0, 0))
    wsp = pl.BlockSpec((4, C, C), lambda b, t: (0, 0, 0))
    bsp = pl.BlockSpec((4, C, 1), lambda b, t: (0, 0, 0))
    # Pack the 4 conv weights / biases into single slabs (fewer tiny DMA operands).
    w_stack = jnp.stack([params["w_a1"], params["w_a2"], params["w_p1"], params["w_p2"]])
    b_stack = jnp.stack([params["b_a1"], params["b_a2"], params["b_p1"], params["b_p2"]])[..., None]
    kernel = functools.partial(_freq_kernel, fuse_trig=FUSE_TRIG)
    grid_spec = pltpu.PrefetchScalarGridSpec(
        num_scalar_prefetch=0, grid=(B, nt),
        in_specs=[img, img, img, att, att, wsp, bsp],
        out_specs=[img, img])
    return pl.pallas_call(
        kernel,
        out_shape=[jax.ShapeDtypeStruct((B, C, L), jnp.bfloat16)] * 2,
        grid_spec=grid_spec,
        compiler_params=_cparams(),
    )(amp2, pha2, pha1, a0[..., None], a1[..., None], w_stack, b_stack)


def _post_pallas(y, params, tile):
    B, C, L = y.shape
    nt = L // tile
    img = pl.BlockSpec((1, C, tile), lambda b, t: (b, 0, t))
    grid_spec = pltpu.PrefetchScalarGridSpec(
        num_scalar_prefetch=0, grid=(B, nt),
        in_specs=[img,
                  pl.BlockSpec((C, C), lambda b, t: (0, 0)),
                  pl.BlockSpec((C, 1), lambda b, t: (0, 0))],
        out_specs=img)
    return pl.pallas_call(
        _post_kernel,
        out_shape=jax.ShapeDtypeStruct((B, C, L), jnp.float32),
        grid_spec=grid_spec,
        compiler_params=_cparams(),
    )(y, params["w_post"], _col(params["b_post"]))


# ----------------------------------------------------------------------------
# Forward pass (Pallas stages + XLA FFT / tiny-attention glue)
# ----------------------------------------------------------------------------
def pre_stage(t2f, t1f, params):
    B, C, H, W = t2f.shape
    HW = H * W
    tile, hw_pad = _tile_and_pad(HW)
    p2, p1 = _pre_pallas(_pad_last(t2f.reshape(B, C, HW), hw_pad),
                         _pad_last(t1f.reshape(B, C, HW), hw_pad),
                         params, tile)
    return (p2[:, :, :HW].reshape(B, C, H, W),
            p1[:, :, :HW].reshape(B, C, H, W))


def spectrum(p2, p1):
    """rfft2 + polar decomposition; bf16 at the Pallas boundary (bandwidth)."""
    t2F = jnp.fft.rfft2(p2)                  # norm='backward' (default)
    t1F = jnp.fft.rfft2(p1)
    return (jnp.abs(t2F).astype(jnp.bfloat16),
            jnp.angle(t2F).astype(jnp.bfloat16),
            jnp.angle(t1F).astype(jnp.bfloat16))


def attention_weights(pha2, pha1, params):
    """GAP + SK attention (O(B*C*d)); hoisted to XLA (per perf review) so the freq
    kernel can be spatially tiled.  2-way softmax == sigmoid of the logit difference."""
    s = jnp.mean(pha2.astype(jnp.float32) + pha1.astype(jnp.float32), axis=(2, 3))  # (B, C)
    z = jax.nn.relu(jnp.einsum('dc,bc->bd', params['w_fc'], s))
    l0 = jnp.einsum('cd,bd->bc', params['w_fc0'], z) + params['b_fc0']
    l1 = jnp.einsum('cd,bd->bc', params['w_fc1'], z) + params['b_fc1']
    a0 = jax.nn.sigmoid(l0 - l1)
    return a0, 1.0 - a0


def tail_stage(amp2, pha2, pha1, params, H, W):
    B, C, Hf, Wf = amp2.shape
    P = Hf * Wf
    tile, p_pad = _tile_and_pad(P)

    # Attention from the *unpadded* phases (true-P mean; no pad-lane contamination).
    a0, a1 = attention_weights(pha2, pha1, params)

    o0, o1 = _freq_pallas(_pad_last(amp2.reshape(B, C, P), p_pad),
                          _pad_last(pha2.reshape(B, C, P), p_pad),
                          _pad_last(pha1.reshape(B, C, P), p_pad),
                          a0, a1, params, tile)
    o0 = o0[:, :, :P].reshape(B, C, Hf, Wf).astype(jnp.float32)
    o1 = o1[:, :, :P].reshape(B, C, Hf, Wf).astype(jnp.float32)

    if FUSE_TRIG:
        real, imag = o0, o1                           # eps already added in-kernel
    else:
        real = o0 * jnp.cos(o1) + 2e-8                # +1e-8 applied twice to real
        imag = o0 * jnp.sin(o1) + 1e-8
    y = jnp.fft.irfft2(lax.complex(real, imag), s=(H, W))

    HW = H * W
    tile_hw, hw_pad = _tile_and_pad(HW)
    out = _post_pallas(_pad_last(y.reshape(B, C, HW), hw_pad), params, tile_hw)
    return out[:, :, :HW].reshape(B, C, H, W)


def frefusion_forward(t2f, t1f, params):
    H, W = t2f.shape[-2:]
    p2, p1 = pre_stage(t2f, t1f, params)
    amp2, pha2, pha1 = spectrum(p2, p1)
    return tail_stage(amp2, pha2, pha1, params, H, W)


# ----------------------------------------------------------------------------
# Pure-JAX reference pieces (for correctness checks)
# ----------------------------------------------------------------------------
def _conv1x1(x, w, b=None):
    y = jnp.einsum('oc,bc...->bo...', w, x)
    if b is not None:
        y = y + b.reshape((1, -1) + (1,) * (x.ndim - 2))
    return y


def pre_ref(t2f, t1f, p):
    return (_conv1x1(t2f, p['w_pre1'], p['b_pre1']) + 1e-8,
            _conv1x1(t1f, p['w_pre2'], p['b_pre2']) + 1e-8)


def tail_ref(amp2, pha2, pha1, p, H, W):
    feats_u = pha2 + pha1
    s = jnp.mean(feats_u, axis=(2, 3), keepdims=True)
    z = jax.nn.relu(_conv1x1(s, p['w_fc']))
    a0 = _conv1x1(z, p['w_fc0'], p['b_fc0'])
    a1 = _conv1x1(z, p['w_fc1'], p['b_fc1'])
    att = jax.nn.softmax(jnp.stack([a0, a1], axis=1), axis=1)
    feats_v = att[:, 0] * pha2 + att[:, 1] * pha1

    def mlp(x, w1, b1, w2, b2):
        h = _conv1x1(x, w1, b1)
        h = jnp.where(h > 0, h, 0.1 * h)
        return _conv1x1(h, w2, b2)

    amp_f = mlp(amp2, p['w_a1'], p['b_a1'], p['w_a2'], p['b_a2'])
    pha_f = mlp(feats_v, p['w_p1'], p['b_p1'], p['w_p2'], p['b_p2'])
    real = amp_f * jnp.cos(pha_f) + 2e-8
    imag = amp_f * jnp.sin(pha_f) + 1e-8
    y = jnp.abs(jnp.fft.irfft2(lax.complex(real, imag), s=(H, W)))
    return _conv1x1(y, p['w_post'], p['b_post'])


# ----------------------------------------------------------------------------
# Parameter init (PyTorch-like uniform fan-in init, deterministic)
# ----------------------------------------------------------------------------
def init_params(key, C, d):
    ks = jax.random.split(key, 19)

    def u(k, shape, fan_in):
        lim = 1.0 / (fan_in ** 0.5)
        return jax.random.uniform(k, shape, jnp.float32, -lim, lim)

    p = {}
    p['w_pre1'] = u(ks[0], (C, C), C);   p['b_pre1'] = u(ks[1], (C,), C)
    p['w_pre2'] = u(ks[2], (C, C), C);   p['b_pre2'] = u(ks[3], (C,), C)
    p['w_a1'] = u(ks[4], (C, C), C);     p['b_a1'] = u(ks[5], (C,), C)
    p['w_a2'] = u(ks[6], (C, C), C);     p['b_a2'] = u(ks[7], (C,), C)
    p['w_p1'] = u(ks[8], (C, C), C);     p['b_p1'] = u(ks[9], (C,), C)
    p['w_p2'] = u(ks[10], (C, C), C);    p['b_p2'] = u(ks[11], (C,), C)
    p['w_post'] = u(ks[12], (C, C), C);  p['b_post'] = u(ks[13], (C,), C)
    p['w_fc'] = u(ks[14], (d, C), C)                      # no bias
    p['w_fc0'] = u(ks[15], (C, d), d);   p['b_fc0'] = u(ks[16], (C,), d)
    p['w_fc1'] = u(ks[17], (C, d), d);   p['b_fc1'] = u(ks[18], (C,), d)
    return p


if __name__ == "__main__":
    key = jax.random.PRNGKey(0)
    k1, k2, kp = jax.random.split(key, 3)

    B, C, H, W = 2, 4, 16, 16
    r, L = 16, 16
    d = max(C // r, L)                   # = 16, matches max(int(C/r), L)

    t2f = jax.random.normal(k1, (B, C, H, W), jnp.float32)
    t1f = jax.random.normal(k2, (B, C, H, W), jnp.float32)
    params = init_params(kp, C, d)

    # Full Pallas-backed forward (run once, block).
    out = jax.block_until_ready(jax.jit(frefusion_forward)(t2f, t1f, params))
    assert out.shape == (B, C, H, W)

    # ---- correctness checks against pure-JAX references ----
    # Stage A: pre 1x1 convs (f32 I/O).
    p2_k, p1_k = pre_stage(t2f, t1f, params)
    p2_r, p1_r = pre_ref(t2f, t1f, params)
    err_pre = max(float(jnp.max(jnp.abs(p2_k - p2_r))),
                  float(jnp.max(jnp.abs(p1_k - p1_r))))
    assert err_pre < 1e-4, f"pre-stage max abs error {err_pre}"

    # Stages B+C (+ FFT glue): both paths consume the same bf16-rounded spectra so
    # the +/-pi angle branch cut and the bf16 boundary cast cannot diverge between
    # the kernel and the reference; remaining delta is the bf16 output cast.
    amp2, pha2, pha1 = spectrum(p2_k, p1_k)
    out_k = tail_stage(amp2, pha2, pha1, params, H, W)
    out_r = tail_ref(amp2.astype(jnp.float32), pha2.astype(jnp.float32),
                     pha1.astype(jnp.float32), params, H, W)
    scale = 1.0 + float(jnp.max(jnp.abs(out_r)))
    err_tail = float(jnp.max(jnp.abs(out_k - out_r)))
    assert err_tail < 2e-2 * scale, f"tail max abs error {err_tail} (scale {scale})"

    print("KERNEL_OK")
</pallas_src>

<mosaic_0001>
module attributes {stable_mosaic.version = 11 : i64} {
  func.func @k(%arg0: memref<8x128xf32, #tpu.memory_space<vmem>>, %arg1: memref<8x128xf32, #tpu.memory_space<vmem>>) attributes {dimension_semantics = [], scalar_prefetch = 0 : i64, scratch_operands = 0 : i64, tpu.core_type = #tpu.core_type<tc>} {
    %c0 = arith.constant 0 : index
    %c0_0 = arith.constant 0 : index
    %0 = vector.load %arg0[%c0, %c0_0] : memref<8x128xf32, #tpu.memory_space<vmem>>, vector<8x128xf32>
    %1 = math.cos %0 : vector<8x128xf32>
    %c0_1 = arith.constant 0 : index
    %c0_2 = arith.constant 0 : index
    %2 = vector.load %arg0[%c0_1, %c0_2] : memref<8x128xf32, #tpu.memory_space<vmem>>, vector<8x128xf32>
    %3 = math.sin %2 : vector<8x128xf32>
    %4 = arith.addf %1, %3 : vector<8x128xf32>
    %c0_3 = arith.constant 0 : index
    %c0_4 = arith.constant 0 : index
    %5 = vector.load %arg1[%c0_3, %c0_4] : memref<8x128xf32, #tpu.memory_space<vmem>>, vector<8x128xf32>
    tpu.vector_store %arg1[%c0_3, %c0_4], %4 {strides = array<i32>} : memref<8x128xf32, #tpu.memory_space<vmem>>, vector<8x128xf32>,
    return
  }
}

module attributes {stable_mosaic.version = 11 : i64} {
  func.func @_pre_kernel(%arg0: i32, %arg1: i32, %arg2: memref<1x4x256xf32, #tpu.memory_space<vmem>>, %arg3: memref<1x4x256xf32, #tpu.memory_space<vmem>>, %arg4: memref<4x4xf32, #tpu.memory_space<vmem>>, %arg5: memref<4x1xf32, #tpu.memory_space<vmem>>, %arg6: memref<4x4xf32, #tpu.memory_space<vmem>>, %arg7: memref<4x1xf32, #tpu.memory_space<vmem>>, %arg8: memref<1x4x256xf32, #tpu.memory_space<vmem>>, %arg9: memref<1x4x256xf32, #tpu.memory_space<vmem>>) attributes {dimension_semantics = [#tpu.dimension_semantics<parallel>, #tpu.dimension_semantics<parallel>], iteration_bounds = array<i64: 2, 1>, scalar_prefetch = 0 : i64, scratch_operands = 0 : i64, tpu.core_type = #tpu.core_type<tc>, window_params = [{transform_indices = @transform_0, window_bounds = array<i64: 1, 4, 256>}, {transform_indices = @transform_1, window_bounds = array<i64: 1, 4, 256>}, {pipeline_mode = #tpu.pipeline_mode<synchronous>, transform_indices = @transform_2, window_bounds = array<i64: 4, 4>}, {pipeline_mode = #tpu.pipeline_mode<synchronous>, transform_indices = @transform_3, window_bounds = array<i64: 4, 1>}, {pipeline_mode = #tpu.pipeline_mode<synchronous>, transform_indices = @transform_4, window_bounds = array<i64: 4, 4>}, {pipeline_mode = #tpu.pipeline_mode<synchronous>, transform_indices = @transform_5, window_bounds = array<i64: 4, 1>}, {transform_indices = @transform_6, window_bounds = array<i64: 1, 4, 256>}, {transform_indices = @transform_7, window_bounds = array<i64: 1, 4, 256>}]} {
    %c0 = arith.constant 0 : index
    %c0_0 = arith.constant 0 : index
    %c0_1 = arith.constant 0 : index
    %0 = vector.load %arg2[%c0, %c0_0, %c0_1] : memref<1x4x256xf32, #tpu.memory_space<vmem>>, vector<1x4x256xf32>
    %1 = vector.shape_cast %0 : vector<1x4x256xf32> to vector<4x256xf32>
    %c0_2 = arith.constant 0 : index
    %c0_3 = arith.constant 0 : index
    %c0_4 = arith.constant 0 : index
    %2 = vector.load %arg3[%c0_2, %c0_3, %c0_4] : memref<1x4x256xf32, #tpu.memory_space<vmem>>, vector<1x4x256xf32>
    %3 = vector.shape_cast %2 : vector<1x4x256xf32> to vector<4x256xf32>
    %c0_5 = arith.constant 0 : index
    %c0_6 = arith.constant 0 : index
    %4 = vector.load %arg4[%c0_5, %c0_6] : memref<4x4xf32, #tpu.memory_space<vmem>>, vector<4x4xf32>
    %cst = arith.constant dense<0.000000e+00> : vector<4x256xf32>
    %5 = tpu.matmul %4, %1, %cst {dimension_numbers = #tpu.dot_dimension_numbers<[1], [0], [0], [1], [0, 0, 1, 1], [], []>} : vector<4x4xf32>, vector<4x256xf32>, vector<4x256xf32> -> vector<4x256xf32>
    %c0_7 = arith.constant 0 : index
    %c0_8 = arith.constant 0 : index
    %6 = vector.load %arg5[%c0_7, %c0_8] : memref<4x1xf32, #tpu.memory_space<vmem>>, vector<4x1xf32>
    %7 = vector.broadcast %6 : vector<4x1xf32> to vector<4x256xf32>
    %8 = arith.addf %5, %7 : vector<4x256xf32>
    %cst_9 = arith.constant 9.99999993E-9 : f32
    %9 = vector.broadcast %cst_9 : f32 to vector<4x256xf32>
    %10 = arith.addf %8, %9 : vector<4x256xf32>
    %c0_10 = arith.constant 0 : index
    %c0_11 = arith.constant 0 : index
    %11 = vector.load %arg6[%c0_10, %c0_11] : memref<4x4xf32, #tpu.memory_space<vmem>>, vector<4x4xf32>
    %cst_12 = arith.constant dense<0.000000e+00> : vector<4x256xf32>
    %12 = tpu.matmul %11, %3, %cst_12 {dimension_numbers = #tpu.dot_dimension_numbers<[1], [0], [0], [1], [0, 0, 1, 1], [], []>} : vector<4x4xf32>, vector<4x256xf32>, vector<4x256xf32> -> vector<4x256xf32>
    %c0_13 = arith.constant 0 : index
    %c0_14 = arith.constant 0 : index
    %13 = vector.load %arg7[%c0_13, %c0_14] : memref<4x1xf32, #tpu.memory_space<vmem>>, vector<4x1xf32>
    %14 = vector.broadcast %13 : vector<4x1xf32> to vector<4x256xf32>
    %15 = arith.addf %12, %14 : vector<4x256xf32>
    %cst_15 = arith.constant 9.99999993E-9 : f32
    %16 = vector.broadcast %cst_15 : f32 to vector<4x256xf32>
    %17 = arith.addf %15, %16 : vector<4x256xf32>
    %c0_16 = arith.constant 0 : index
    %c0_17 = arith.constant 0 : index
    %c0_18 = arith.constant 0 : index
    %18 = vector.load %arg8[%c0_16, %c0_17, %c0_18] : memref<1x4x256xf32, #tpu.memory_space<vmem>>, vector<1x4x256xf32>
    %19 = vector.shape_cast %18 : vector<1x4x256xf32> to vector<4x256xf32>
    %20 = vector.shape_cast %10 : vector<4x256xf32> to vector<1x4x256xf32>
    tpu.vector_store %arg8[%c0_16, %c0_17, %c0_18], %20 {strides = array<i32>} : memref<1x4x256xf32, #tpu.memory_space<vmem>>, vector<1x4x256xf32>,
    %c0_19 = arith.constant 0 : index
    %c0_20 = arith.constant 0 : index
    %c0_21 = arith.constant 0 : index
    %21 = vector.load %arg9[%c0_19, %c0_20, %c0_21] : memref<1x4x256xf32, #tpu.memory_space<vmem>>, vector<1x4x256xf32>
    %22 = vector.shape_cast %21 : vector<1x4x256xf32> to vector<4x256xf32>
    %23 = vector.shape_cast %17 : vector<4x256xf32> to vector<1x4x256xf32>
    tpu.vector_store %arg9[%c0_19, %c0_20, %c0_21], %23 {strides = array<i32>} : memref<1x4x256xf32, #tpu.memory_space<vmem>>, vector<1x4x256xf32>,
    return
  }
  func.func @transform_0(%arg0: i32, %arg1: i32) -> (i32, i32, i32) {
    %c0_i32 = arith.constant 0 : i32
    %c0_i32_0 = arith.constant 0 : i32
    return %arg0, %c0_i32, %arg1 : i32, i32, i32
  }
  func.func @transform_1(%arg0: i32, %arg1: i32) -> (i32, i32, i32) {
    %c0_i32 = arith.constant 0 : i32
    %c0_i32_0 = arith.constant 0 : i32
    return %arg0, %c0_i32, %arg1 : i32, i32, i32
  }
  func.func @transform_2(%arg0: i32, %arg1: i32) -> (i32, i32) {
    %c0_i32 = arith.constant 0 : i32
    %c0_i32_0 = arith.constant 0 : i32
    %c0_i32_1 = arith.constant 0 : i32
    return %c0_i32, %c0_i32_0 : i32, i32
  }
  func.func @transform_3(%arg0: i32, %arg1: i32) -> (i32, i32) {
    %c0_i32 = arith.constant 0 : i32
    %c0_i32_0 = arith.constant 0 : i32
    %c0_i32_1 = arith.constant 0 : i32
    return %c0_i32, %c0_i32_0 : i32, i32
  }
  func.func @transform_4(%arg0: i32, %arg1: i32) -> (i32, i32) {
    %c0_i32 = arith.constant 0 : i32
    %c0_i32_0 = arith.constant 0 : i32
    %c0_i32_1 = arith.constant 0 : i32
    return %c0_i32, %c0_i32_0 : i32, i32
  }
  func.func @transform_5(%arg0: i32, %arg1: i32) -> (i32, i32) {
    %c0_i32 = arith.constant 0 : i32
    %c0_i32_0 = arith.constant 0 : i32
    %c0_i32_1 = arith.constant 0 : i32
    return %c0_i32, %c0_i32_0 : i32, i32
  }
  func.func @transform_6(%arg0: i32, %arg1: i32) -> (i32, i32, i32) {
    %c0_i32 = arith.constant 0 : i32
    %c0_i32_0 = arith.constant 0 : i32
    return %arg0, %c0_i32, %arg1 : i32, i32, i32
  }
  func.func @transform_7(%arg0: i32, %arg1: i32) -> (i32, i32, i32) {
    %c0_i32 = arith.constant 0 : i32
    %c0_i32_0 = arith.constant 0 : i32
    return %arg0, %c0_i32, %arg1 : i32, i32, i32
  }
}

module attributes {stable_mosaic.version = 11 : i64} {
  func.func @_freq_kernel(%arg0: i32, %arg1: i32, %arg2: memref<1x4x256xbf16, #tpu.memory_space<vmem>>, %arg3: memref<1x4x256xbf16, #tpu.memory_space<vmem>>, %arg4: memref<1x4x256xbf16, #tpu.memory_space<vmem>>, %arg5: memref<1x4x1xf32, #tpu.memory_space<vmem>>, %arg6: memref<1x4x1xf32, #tpu.memory_space<vmem>>, %arg7: memref<4x4x4xf32, #tpu.memory_space<vmem>>, %arg8: memref<4x4x1xf32, #tpu.memory_space<vmem>>, %arg9: memref<1x4x256xbf16, #tpu.memory_space<vmem>>, %arg10: memref<1x4x256xbf16, #tpu.memory_space<vmem>>) attributes {dimension_semantics = [#tpu.dimension_semantics<parallel>, #tpu.dimension_semantics<parallel>], iteration_bounds = array<i64: 2, 1>, scalar_prefetch = 0 : i64, scratch_operands = 0 : i64, tpu.core_type = #tpu.core_type<tc>, window_params = [{transform_indices = @transform_0, window_bounds = array<i64: 1, 4, 256>}, {transform_indices = @transform_1, window_bounds = array<i64: 1, 4, 256>}, {transform_indices = @transform_2, window_bounds = array<i64: 1, 4, 256>}, {transform_indices = @transform_3, window_bounds = array<i64: 1, 4, 1>}, {transform_indices = @transform_4, window_bounds = array<i64: 1, 4, 1>}, {pipeline_mode = #tpu.pipeline_mode<synchronous>, transform_indices = @transform_5, window_bounds = array<i64: 4, 4, 4>}, {pipeline_mode = #tpu.pipeline_mode<synchronous>, transform_indices = @transform_6, window_bounds = array<i64: 4, 4, 1>}, {transform_indices = @transform_7, window_bounds = array<i64: 1, 4, 256>}, {transform_indices = @transform_8, window_bounds = array<i64: 1, 4, 256>}]} {
    %c0 = arith.constant 0 : index
    %c0_0 = arith.constant 0 : index
    %c0_1 = arith.constant 0 : index
    %0 = vector.load %arg2[%c0, %c0_0, %c0_1] : memref<1x4x256xbf16, #tpu.memory_space<vmem>>, vector<1x4x256xbf16>
    %1 = vector.shape_cast %0 : vector<1x4x256xbf16> to vector<4x256xbf16>
    %2 = arith.extf %1 : vector<4x256xbf16> to vector<4x256xf32>
    %c0_2 = arith.constant 0 : index
    %c0_3 = arith.constant 0 : index
    %c0_4 = arith.constant 0 : index
    %3 = vector.load %arg3[%c0_2, %c0_3, %c0_4] : memref<1x4x256xbf16, #tpu.memory_space<vmem>>, vector<1x4x256xbf16>
    %4 = vector.shape_cast %3 : vector<1x4x256xbf16> to vector<4x256xbf16>
    %5 = arith.extf %4 : vector<4x256xbf16> to vector<4x256xf32>
    %c0_5 = arith.constant 0 : index
    %c0_6 = arith.constant 0 : index
    %c0_7 = arith.constant 0 : index
    %6 = vector.load %arg4[%c0_5, %c0_6, %c0_7] : memref<1x4x256xbf16, #tpu.memory_space<vmem>>, vector<1x4x256xbf16>
    %7 = vector.shape_cast %6 : vector<1x4x256xbf16> to vector<4x256xbf16>
    %8 = arith.extf %7 : vector<4x256xbf16> to vector<4x256xf32>
    %c0_8 = arith.constant 0 : index
    %c0_9 = arith.constant 0 : index
    %c0_10 = arith.constant 0 : index
    %9 = vector.load %arg5[%c0_8, %c0_9, %c0_10] : memref<1x4x1xf32, #tpu.memory_space<vmem>>, vector<1x4x1xf32>
    %10 = vector.shape_cast %9 : vector<1x4x1xf32> to vector<4x1xf32>
    %c0_11 = arith.constant 0 : index
    %c0_12 = arith.constant 0 : index
    %c0_13 = arith.constant 0 : index
    %11 = vector.load %arg6[%c0_11, %c0_12, %c0_13] : memref<1x4x1xf32, #tpu.memory_space<vmem>>, vector<1x4x1xf32>
    %12 = vector.shape_cast %11 : vector<1x4x1xf32> to vector<4x1xf32>
    %13 = vector.broadcast %10 : vector<4x1xf32> to vector<4x256xf32>
    %14 = arith.mulf %13, %5 : vector<4x256xf32>
    %15 = vector.broadcast %12 : vector<4x1xf32> to vector<4x256xf32>
    %16 = arith.mulf %15, %8 : vector<4x256xf32>
    %17 = arith.addf %14, %16 : vector<4x256xf32>
    %c0_14 = arith.constant 0 : index
    %c0_15 = arith.constant 0 : index
    %c0_16 = arith.constant 0 : index
    %18 = vector.load %arg7[%c0_14, %c0_15, %c0_16] : memref<4x4x4xf32, #tpu.memory_space<vmem>>, vector<1x4x4xf32>
    %19 = vector.shape_cast %18 : vector<1x4x4xf32> to vector<4x4xf32>
    %c0_17 = arith.constant 0 : index
    %c0_18 = arith.constant 0 : index
    %c0_19 = arith.constant 0 : index
    %20 = vector.load %arg8[%c0_17, %c0_18, %c0_19] : memref<4x4x1xf32, #tpu.memory_space<vmem>>, vector<1x4x1xf32>
    %21 = vector.shape_cast %20 : vector<1x4x1xf32> to vector<4x1xf32>
    %c1 = arith.constant 1 : index
    %c0_20 = arith.constant 0 : index
    %c0_21 = arith.constant 0 : index
    %22 = vector.load %arg7[%c1, %c0_20, %c0_21] : memref<4x4x4xf32, #tpu.memory_space<vmem>>, vector<1x4x4xf32>
    %23 = vector.shape_cast %22 : vector<1x4x4xf32> to vector<4x4xf32>
    %c1_22 = arith.constant 1 : index
    %c0_23 = arith.constant 0 : index
    %c0_24 = arith.constant 0 : index
    %24 = vector.load %arg8[%c1_22, %c0_23, %c0_24] : memref<4x4x1xf32, #tpu.memory_space<vmem>>, vector<1x4x1xf32>
    %25 = vector.shape_cast %24 : vector<1x4x1xf32> to vector<4x1xf32>
    %cst = arith.constant dense<0.000000e+00> : vector<4x256xf32>
    %26 = tpu.matmul %19, %2, %cst {dimension_numbers = #tpu.dot_dimension_numbers<[1], [0], [0], [1], [0, 0, 1, 1], [], []>} : vector<4x4xf32>, vector<4x256xf32>, vector<4x256xf32> -> vector<4x256xf32>
    %27 = vector.broadcast %21 : vector<4x1xf32> to vector<4x256xf32>
    %28 = arith.addf %26, %27 : vector<4x256xf32>
    %cst_25 = arith.constant 0.000000e+00 : f32
    %29 = vector.broadcast %cst_25 : f32 to vector<4x256xf32>
    %30 = arith.cmpf ogt, %28, %29 : vector<4x256xf32>
    %cst_26 = arith.constant 1.000000e-01 : f32
    %31 = vector.broadcast %cst_26 : f32 to vector<4x256xf32>
    %32 = arith.mulf %31, %28 : vector<4x256xf32>
    %33 = arith.select %30, %28, %32 : vector<4x256xi1>, vector<4x256xf32>
    %cst_27 = arith.constant dense<0.000000e+00> : vector<4x256xf32>
    %34 = tpu.matmul %23, %33, %cst_27 {dimension_numbers = #tpu.dot_dimension_numbers<[1], [0], [0], [1], [0, 0, 1, 1], [], []>} : vector<4x4xf32>, vector<4x256xf32>, vector<4x256xf32> -> vector<4x256xf32>
    %35 = vector.broadcast %25 : vector<4x1xf32> to vector<4x256xf32>
    %36 = arith.addf %34, %35 : vector<4x256xf32>
    %c2 = arith.constant 2 : index
    %c0_28 = arith.constant 0 : index
    %c0_29 = arith.constant 0 : index
    %37 = vector.load %arg7[%c2, %c0_28, %c0_29] : memref<4x4x4xf32, #tpu.memory_space<vmem>>, vector<1x4x4xf32>
    %38 = vector.shape_cast %37 : vector<1x4x4xf32> to vector<4x4xf32>
    %c2_30 = arith.constant 2 : index
    %c0_31 = arith.constant 0 : index
    %c0_32 = arith.constant 0 : index
    %39 = vector.load %arg8[%c2_30, %c0_31, %c0_32] : memref<4x4x1xf32, #tpu.memory_space<vmem>>, vector<1x4x1xf32>
    %40 = vector.shape_cast %39 : vector<1x4x1xf32> to vector<4x1xf32>
    %c3 = arith.constant 3 : index
    %c0_33 = arith.constant 0 : index
    %c0_34 = arith.constant 0 : index
    %41 = vector.load %arg7[%c3, %c0_33, %c0_34] : memref<4x4x4xf32, #tpu.memory_space<vmem>>, vector<1x4x4xf32>
    %42 = vector.shape_cast %41 : vector<1x4x4xf32> to vector<4x4xf32>
    %c3_35 = arith.constant 3 : index
    %c0_36 = arith.constant 0 : index
    %c0_37 = arith.constant 0 : index
    %43 = vector.load %arg8[%c3_35, %c0_36, %c0_37] : memref<4x4x1xf32, #tpu.memory_space<vmem>>, vector<1x4x1xf32>
    %44 = vector.shape_cast %43 : vector<1x4x1xf32> to vector<4x1xf32>
    %cst_38 = arith.constant dense<0.000000e+00> : vector<4x256xf32>
    %45 = tpu.matmul %38, %17, %cst_38 {dimension_numbers = #tpu.dot_dimension_numbers<[1], [0], [0], [1], [0, 0, 1, 1], [], []>} : vector<4x4xf32>, vector<4x256xf32>, vector<4x256xf32> -> vector<4x256xf32>
    %46 = vector.broadcast %40 : vector<4x1xf32> to vector<4x256xf32>
    %47 = arith.addf %45, %46 : vector<4x256xf32>
    %cst_39 = arith.constant 0.000000e+00 : f32
    %48 = vector.broadcast %cst_39 : f32 to vector<4x256xf32>
    %49 = arith.cmpf ogt, %47, %48 : vector<4x256xf32>
    %cst_40 = arith.constant 1.000000e-01 : f32
    %50 = vector.broadcast %cst_40 : f32 to vector<4x256xf32>
    %51 = arith.mulf %50, %47 : vector<4x256xf32>
    %52 = arith.select %49, %47, %51 : vector<4x256xi1>, vector<4x256xf32>
    %cst_41 = arith.constant dense<0.000000e+00> : vector<4x256xf32>
    %53 = tpu.matmul %42, %52, %cst_41 {dimension_numbers = #tpu.dot_dimension_numbers<[1], [0], [0], [1], [0, 0, 1, 1], [], []>} : vector<4x4xf32>, vector<4x256xf32>, vector<4x256xf32> -> vector<4x256xf32>
    %54 = vector.broadcast %44 : vector<4x1xf32> to vector<4x256xf32>
    %55 = arith.addf %53, %54 : vector<4x256xf32>
    %56 = arith.truncf %36 : vector<4x256xf32> to vector<4x256xbf16>
    %c0_42 = arith.constant 0 : index
    %c0_43 = arith.constant 0 : index
    %c0_44 = arith.constant 0 : index
    %57 = vector.load %arg9[%c0_42, %c0_43, %c0_44] : memref<1x4x256xbf16, #tpu.memory_space<vmem>>, vector<1x4x256xbf16>
    %58 = vector.shape_cast %57 : vector<1x4x256xbf16> to vector<4x256xbf16>
    %59 = vector.shape_cast %56 : vector<4x256xbf16> to vector<1x4x256xbf16>
    tpu.vector_store %arg9[%c0_42, %c0_43, %c0_44], %59 {strides = array<i32>} : memref<1x4x256xbf16, #tpu.memory_space<vmem>>, vector<1x4x256xbf16>,
    %60 = arith.truncf %55 : vector<4x256xf32> to vector<4x256xbf16>
    %c0_45 = arith.constant 0 : index
    %c0_46 = arith.constant 0 : index
    %c0_47 = arith.constant 0 : index
    %61 = vector.load %arg10[%c0_45, %c0_46, %c0_47] : memref<1x4x256xbf16, #tpu.memory_space<vmem>>, vector<1x4x256xbf16>
    %62 = vector.shape_cast %61 : vector<1x4x256xbf16> to vector<4x256xbf16>
    %63 = vector.shape_cast %60 : vector<4x256xbf16> to vector<1x4x256xbf16>
    tpu.vector_store %arg10[%c0_45, %c0_46, %c0_47], %63 {strides = array<i32>} : memref<1x4x256xbf16, #tpu.memory_space<vmem>>, vector<1x4x256xbf16>,
    return
  }
  func.func @transform_0(%arg0: i32, %arg1: i32) -> (i32, i32, i32) {
    %c0_i32 = arith.constant 0 : i32
    %c0_i32_0 = arith.constant 0 : i32
    return %arg0, %c0_i32, %arg1 : i32, i32, i32
  }
  func.func @transform_1(%arg0: i32, %arg1: i32) -> (i32, i32, i32) {
    %c0_i32 = arith.constant 0 : i32
    %c0_i32_0 = arith.constant 0 : i32
    return %arg0, %c0_i32, %arg1 : i32, i32, i32
  }
  func.func @transform_2(%arg0: i32, %arg1: i32) -> (i32, i32, i32) {
    %c0_i32 = arith.constant 0 : i32
    %c0_i32_0 = arith.constant 0 : i32
    return %arg0, %c0_i32, %arg1 : i32, i32, i32
  }
  func.func @transform_3(%arg0: i32, %arg1: i32) -> (i32, i32, i32) {
    %c0_i32 = arith.constant 0 : i32
    %c0_i32_0 = arith.constant 0 : i32
    %c0_i32_1 = arith.constant 0 : i32
    return %arg0, %c0_i32, %c0_i32_0 : i32, i32, i32
  }
  func.func @transform_4(%arg0: i32, %arg1: i32) -> (i32, i32, i32) {
    %c0_i32 = arith.constant 0 : i32
    %c0_i32_0 = arith.constant 0 : i32
    %c0_i32_1 = arith.constant 0 : i32
    return %arg0, %c0_i32, %c0_i32_0 : i32, i32, i32
  }
  func.func @transform_5(%arg0: i32, %arg1: i32) -> (i32, i32, i32) {
    %c0_i32 = arith.constant 0 : i32
    %c0_i32_0 = arith.constant 0 : i32
    %c0_i32_1 = arith.constant 0 : i32
    %c0_i32_2 = arith.constant 0 : i32
    return %c0_i32, %c0_i32_0, %c0_i32_1 : i32, i32, i32
  }
  func.func @transform_6(%arg0: i32, %arg1: i32) -> (i32, i32, i32) {
    %c0_i32 = arith.constant 0 : i32
    %c0_i32_0 = arith.constant 0 : i32
    %c0_i32_1 = arith.constant 0 : i32
    %c0_i32_2 = arith.constant 0 : i32
    return %c0_i32, %c0_i32_0, %c0_i32_1 : i32, i32, i32
  }
  func.func @transform_7(%arg0: i32, %arg1: i32) -> (i32, i32, i32) {
    %c0_i32 = arith.constant 0 : i32
    %c0_i32_0 = arith.constant 0 : i32
    return %arg0, %c0_i32, %arg1 : i32, i32, i32
  }
  func.func @transform_8(%arg0: i32, %arg1: i32) -> (i32, i32, i32) {
    %c0_i32 = arith.constant 0 : i32
    %c0_i32_0 = arith.constant 0 : i32
    return %arg0, %c0_i32, %arg1 : i32, i32, i32
  }
}

module attributes {stable_mosaic.version = 11 : i64} {
  func.func @_post_kernel(%arg0: i32, %arg1: i32, %arg2: memref<1x4x256xf32, #tpu.memory_space<vmem>>, %arg3: memref<4x4xf32, #tpu.memory_space<vmem>>, %arg4: memref<4x1xf32, #tpu.memory_space<vmem>>, %arg5: memref<1x4x256xf32, #tpu.memory_space<vmem>>) attributes {dimension_semantics = [#tpu.dimension_semantics<parallel>, #tpu.dimension_semantics<parallel>], iteration_bounds = array<i64: 2, 1>, scalar_prefetch = 0 : i64, scratch_operands = 0 : i64, tpu.core_type = #tpu.core_type<tc>, window_params = [{transform_indices = @transform_0, window_bounds = array<i64: 1, 4, 256>}, {pipeline_mode = #tpu.pipeline_mode<synchronous>, transform_indices = @transform_1, window_bounds = array<i64: 4, 4>}, {pipeline_mode = #tpu.pipeline_mode<synchronous>, transform_indices = @transform_2, window_bounds = array<i64: 4, 1>}, {transform_indices = @transform_3, window_bounds = array<i64: 1, 4, 256>}]} {
    %c0 = arith.constant 0 : index
    %c0_0 = arith.constant 0 : index
    %c0_1 = arith.constant 0 : index
    %0 = vector.load %arg2[%c0, %c0_0, %c0_1] : memref<1x4x256xf32, #tpu.memory_space<vmem>>, vector<1x4x256xf32>
    %1 = vector.shape_cast %0 : vector<1x4x256xf32> to vector<4x256xf32>
    %2 = math.absf %1 : vector<4x256xf32>
    %c0_2 = arith.constant 0 : index
    %c0_3 = arith.constant 0 : index
    %3 = vector.load %arg3[%c0_2, %c0_3] : memref<4x4xf32, #tpu.memory_space<vmem>>, vector<4x4xf32>
    %cst = arith.constant dense<0.000000e+00> : vector<4x256xf32>
    %4 = tpu.matmul %3, %2, %cst {dimension_numbers = #tpu.dot_dimension_numbers<[1], [0], [0], [1], [0, 0, 1, 1], [], []>} : vector<4x4xf32>, vector<4x256xf32>, vector<4x256xf32> -> vector<4x256xf32>
    %c0_4 = arith.constant 0 : index
    %c0_5 = arith.constant 0 : index
    %5 = vector.load %arg4[%c0_4, %c0_5] : memref<4x1xf32, #tpu.memory_space<vmem>>, vector<4x1xf32>
    %6 = vector.broadcast %5 : vector<4x1xf32> to vector<4x256xf32>
    %7 = arith.addf %4, %6 : vector<4x256xf32>
    %c0_6 = arith.constant 0 : index
    %c0_7 = arith.constant 0 : index
    %c0_8 = arith.constant 0 : index
    %8 = vector.load %arg5[%c0_6, %c0_7, %c0_8] : memref<1x4x256xf32, #tpu.memory_space<vmem>>, vector<1x4x256xf32>
    %9 = vector.shape_cast %8 : vector<1x4x256xf32> to vector<4x256xf32>
    %10 = vector.shape_cast %7 : vector<4x256xf32> to vector<1x4x256xf32>
    tpu.vector_store %arg5[%c0_6, %c0_7, %c0_8], %10 {strides = array<i32>} : memref<1x4x256xf32, #tpu.memory_space<vmem>>, vector<1x4x256xf32>,
    return
  }
  func.func @transform_0(%arg0: i32, %arg1: i32) -> (i32, i32, i32) {
    %c0_i32 = arith.constant 0 : i32
    %c0_i32_0 = arith.constant 0 : i32
    return %arg0, %c0_i32, %arg1 : i32, i32, i32
  }
  func.func @transform_1(%arg0: i32, %arg1: i32) -> (i32, i32) {
    %c0_i32 = arith.constant 0 : i32
    %c0_i32_0 = arith.constant 0 : i32
    %c0_i32_1 = arith.constant 0 : i32
    return %c0_i32, %c0_i32_0 : i32, i32
  }
  func.func @transform_2(%arg0: i32, %arg1: i32) -> (i32, i32) {
    %c0_i32 = arith.constant 0 : i32
    %c0_i32_0 = arith.constant 0 : i32
    %c0_i32_1 = arith.constant 0 : i32
    return %c0_i32, %c0_i32_0 : i32, i32
  }
  func.func @transform_3(%arg0: i32, %arg1: i32) -> (i32, i32, i32) {
    %c0_i32 = arith.constant 0 : i32
    %c0_i32_0 = arith.constant 0 : i32
    return %arg0, %c0_i32, %arg1 : i32, i32, i32
  }
}

</mosaic_0001>

<bundles_post_ra>
// kernel: tpu_custom_call.1
= control target key start
LH: loop header
LB: loop body
LE: loop exit
PB: predicated region body
PF: predicated region fallthrough
CT: control target
= control target key end

     0   :  { %6 = vsyncpa [#allocation3], 0  ;;  %s359_s0 = inlined_call_operand.hbm [shape: f32[8,128], index: 0, kind: input, shape index: {}]   ;;  %s360_s1 = inlined_call_operand.hbm [shape: f32[8,128], index: 1, kind: output, shape index: {}]  }
   0x1   :  { %7 = vsyncpa [#allocation4], 0  ;;  %s314_s6 = smov [#allocation2]  }
   0x2   :  { %s14_s7 = sshll.u32 %s314_s6, 4  ;;  %s15_s7 = int_to_ptr.vmem [resolvable:$true] %s14_s7 }
   0x3   :  { %s278_s8 = scalar_lea.vmem %s15_s7, 128  ;;  %p283_p1 = scmp.lt.s32.totalorder %s15_s7, %s15_s7 }
   0x4   :  { %p279_p0 = scmp.ne.s32.totalorder %s15_s7, %s278_s8  ;;  %p284_p2 = scmp.lt.s32.totalorder %s278_s8, %s278_s8 }
   0x6   :  { %p285_p3 = por %p284_p2, %p283_p1 }
   0x8   :  { %p286_p4 = pnand %p285_p3, %p279_p0 }
   0xa   :  { %289 = shalt.err (!%p286_p4)
}
   0xb   :  { %17 = dma.hbm_to_vmem [thread:$0]  %s359_s0, 128, %s15_s7, [#allocation3]  }
   0xc   :  { %310 = dma.done.wait [#allocation3], 128  }
   0xd   :  { %311 = vsyncadd [#allocation3], 4294967168  ;;  %v335_v0 = vld [vmem:[#allocation2] sm:$0xff]  ;;  %v315_v12 = vmov 683565275   ;;  %s321_s0 = smov [#allocation5]  }
   0xe   :  { %v25_v1 = vand.u32 2139095040, %v335_v0  ;;  %v22_v3 = vand.u32 2147483647, %v335_v0  ;;  %v316_v14 = vmov 2475754826   ;;  %vm24_vm7 = vcmp.lt.s32.totalorder %v335_v0, 0 }
   0xf   :  { %v317_v16 = vmov 2131351028   ;;  %v318_v18 = vmov 2102212464   ;;  %v319_v20 = vmov 920167782   ;;  %vm114_vm15 = vweird.f32 %v335_v0 }
  0x10   :  { %v26_v2 = vshrl.u32 %v25_v1, 23  ;;  %v29_v6 = vand.u32 8388607, %v22_v3  ;;  %v320_v27 = vmov 1326507024   ;;  %s237_s11 = sshll.u32 %s321_s0, 4  ;;  %s238_s11 = int_to_ptr.vmem [resolvable:$true] %s237_s11 }
  0x11   :  { %vm23_vm8 = vcmp.le.f32.partialorder %v22_v3, 0.7853982  ;;  %s290_s12 = scalar_lea.vmem %s238_s11, 128  ;;  %p295_p6 = scmp.lt.s32.totalorder %s238_s11, %s238_s11 }
  0x12   :  { %v246_v4 = vadd.s32 4294967169, %v26_v2  ;;  %v30_v9 = vor.u32 8388608, %v29_v6  ;;  %p291_p5 = scmp.ne.s32.totalorder %s238_s11, %s290_s12  ;;  %p296_p7 = scmp.lt.s32.totalorder %s290_s12, %s290_s12 }
  0x14   :  { %v32_v5 = vadd.s32 1, %v246_v4  ;;  %v70_v29 = vshll.u32 %v30_v9, 8  ;;  %p297_p8 = por %p296_p7, %p295_p6 }
  0x16   :  { %vm33_vm0 = vcmp.gt.s32.totalorder %v32_v5, 0  ;;  %p298_p9 = pnand %p297_p8, %p291_p5 }
  0x17   :  { %v34_v7 = vsel %vm33_vm0, %v32_v5, 0 }
  0x18   :  { %v36_v8 = vand.u32 31, %v34_v7  ;;  %v35_v10 = vshrl.u32 %v34_v7, 5 }
  0x1a   :  { %v37_v11 = vsub.s32 32, %v36_v8  ;;  %v39_v13 = vshll.u32 %v315_v12, %v36_v8  ;;  %v42_v15 = vshll.u32 %v316_v14, %v36_v8  ;;  %v45_v17 = vshll.u32 %v317_v16, %v36_v8 }
  0x1b   :  { %v48_v19 = vshll.u32 %v318_v18, %v36_v8  ;;  %v51_v21 = vshll.u32 %v319_v20, %v36_v8  ;;  %vm54_vm1 = vcmp.lt.s32.totalorder %v35_v10, 1  ;;  %vm57_vm2 = vcmp.lt.s32.totalorder %v35_v10, 4 }
  0x1c   :  { %v38_v22 = vshrl.u32 %v315_v12, %v37_v11  ;;  %v40_v23 = vshrl.u32 %v316_v14, %v37_v11  ;;  %v43_v24 = vshrl.u32 %v317_v16, %v37_v11  ;;  %v46_v25 = vshrl.u32 %v318_v18, %v37_v11 }
  0x1d   :  { %v49_v26 = vshrl.u32 %v319_v20, %v37_v11  ;;  %v52_v28 = vshrl.u32 %v320_v27, %v37_v11  ;;  %vm55_vm3 = vcmp.lt.s32.totalorder %v35_v10, 2  ;;  %vm56_vm4 = vcmp.lt.s32.totalorder %v35_v10, 3 }
  0x1e   :  { %v41_v30 = vor.u32 %v40_v23, %v39_v13  ;;  %v44_v31 = vor.u32 %v43_v24, %v42_v15  ;;  %v47_v32 = vor.u32 %v46_v25, %v45_v17 }
  0x1f   :  { %v50_v33 = vor.u32 %v49_v26, %v48_v19  ;;  %v53_v34 = vor.u32 %v52_v28, %v51_v21 }
  0x20   :  { %v58_v35 = vsel %vm54_vm1, %v38_v22, %v41_v30  ;;  %v59_v36 = vsel %vm57_vm2, %v47_v32, 2102212464  ;;  %v62_v37 = vsel %vm54_vm1, %v41_v30, %v44_v31  ;;  %v66_v38 = vsel %vm54_vm1, %v44_v31, %v47_v32 }
  0x21   :  { %v60_v39 = vsel %vm56_vm4, %v44_v31, %v59_v36  ;;  %v63_v40 = vsel %vm57_vm2, %v50_v33, 920167782  ;;  %v67_v41 = vsel %vm57_vm2, %v53_v34, 1326507024 }
  0x22   :  { %v64_v42 = vsel %vm56_vm4, %v47_v32, %v63_v40  ;;  %v68_v43 = vsel %vm56_vm4, %v50_v33, %v67_v41  ;;  %v61_v44 = vsel %vm55_vm3, %v58_v35, %v60_v39 }
  0x23   :  { %v65_v45 = vsel %vm55_vm3, %v62_v37, %v64_v42  ;;  %v69_v46 = vsel %vm55_vm3, %v66_v38, %v68_v43  ;;  %v77_v51 = vmul.u32 %v70_v29, %v61_v44 }
  0x24   :  { %v341_v47 = vmul.u32.u64.low %v70_v29, %v69_v46  ;;  %v342_v48 = vmul.u32.u64.high %v70_v29, %v69_v46, %v341_v47  ;;  %v344_v49 = vmul.u32.u64.low %v70_v29, %v65_v45  ;;  %v345_v50 = vmul.u32.u64.high %v70_v29, %v65_v45, %v344_v49 }
  0x26   :  { %vm79_vm5 = vc.u32 %v342_v48, %v344_v49  ;;  %v80_v52 = vadd.s32 1, %v345_v50  ;;  %v78_v63 = vadd.s32 %v344_v49, %v342_v48 }
  0x28   :  { %v81_v53 = vsel %vm79_vm5, %v80_v52, %v345_v50 }
  0x29   :  { %v82_v54 = vadd.s32 %v81_v53, %v77_v51 }
  0x2b   :  { %v83_v55 = vadd.s32 536870912, %v82_v54 }
  0x2d   :  { %v84_v56 = vshrl.u32 %v83_v55, 30 }
  0x2f   :  { %v85_v57 = vshll.u32 %v84_v56, 30  ;;  %v108_v14 = vsub.s32 4, %v84_v56 }
  0x31   :  { %v86_v58 = vsub.s32 %v82_v54, %v85_v57  ;;  %v109_v17 = vsel %vm24_vm7, %v108_v14, %v84_v56 }
  0x32   :  { %v111_v19 = vsel %vm23_vm8, 0, %v109_v17 }
  0x33   :  { %v88_v59 = vsub.s32 0, %v86_v58  ;;  %v218_v20 = vadd.s32 3, %v111_v19  ;;  %v115_v21 = vand.u32 3, %v111_v19 }
  0x35   :  { %v247_v60 = vmin.u32 %v88_v59, %v86_v58  ;;  %v219_v22 = vand.u32 3, %v218_v20  ;;  %vm120_vm9 = vcmp.eq.s32.totalorder %v115_v21, 2  ;;  %vm117_vm11 = vcmp.eq.s32.totalorder %v115_v21, 0 }
  0x36   :  { %vm116_vm13 = vcmp.lt.s32.totalorder %v115_v21, 2 }
  0x37   :  { %v90_v61 = vclz %v247_v60  ;;  %vm224_vm10 = vcmp.eq.s32.totalorder %v219_v22, 2  ;;  %vm221_vm12 = vcmp.eq.s32.totalorder %v219_v22, 0  ;;  %vm220_vm14 = vcmp.lt.s32.totalorder %v219_v22, 2 }
  0x39   :  { %v248_v62 = vadd.s32 4294967294, %v90_v61 }
  0x3b   :  { %vm249_vm6 = vcmp.lt.s32.totalorder %v248_v62, 0 }
  0x3c   :  { %v93_v1 = vsel %vm249_vm6, 0, %v248_v62 }
  0x3d   :  { %v94_v2 = vsub.s32 32, %v93_v1  ;;  %v95_v4 = vshll.u32 %v86_v58, %v93_v1  ;;  %v98_v5 = vsub.s32 4294967266, %v93_v1 }
  0x3f   :  { %v96_v6 = vshrl.u32 %v78_v63, %v94_v2  ;;  %v99_v7 = vadd.s32 127, %v98_v5 }
  0x41   :  { %v97_v8 = vor.u32 %v96_v6, %v95_v4  ;;  %v100_v9 = vshll.u32 %v99_v7, 23 }
  0x43   :  { %v101_v10 = vor.u32 4788187, %v100_v9  ;;  %v104_v11 = vcvt.s32.f32 %v97_v8 }
  0x45   :  { %v102_v12 = vand.u32 2147483647, %v101_v10 }
  0x47   :  { %v105_v13 = vmul.f32 %v104_v11, %v102_v12 }
  0x49   :  { %v106_v15 = vxor.u32 2147483648, %v105_v13 }
  0x4b   :  { %v107_v16 = vsel %vm24_vm7, %v106_v15, %v105_v13 }
  0x4c   :  { %v110_v18 = vsel %vm23_vm8, %v335_v0, %v107_v16 }
  0x4d   :  { %266 = vcosq.f32 %v110_v18 }
  0x4e   :  { %268 = vsinq.f32 %v110_v18 }
  0x5a   :  { %v267_v23 = vpop.eup %266 }
  0x5b   :  { %v269_v24 = vpop.eup %268  ;;  %v121_v25 = vxor.u32 2147483648, %v267_v23 }
  0x5c   :  { %v118_v3 = vxor.u32 2147483648, %v269_v24 }
  0x5d   :  { %v122_v26 = vsel %vm120_vm9, %v121_v25, %v269_v24  ;;  %v226_v27 = vsel %vm224_vm10, %v121_v25, %v269_v24 }
  0x5e   :  { %v119_v28 = vsel %vm117_vm11, %v267_v23, %v118_v3  ;;  %v223_v29 = vsel %vm221_vm12, %v267_v23, %v118_v3 }
  0x5f   :  { %v123_v30 = vsel %vm116_vm13, %v119_v28, %v122_v26  ;;  %v227_v31 = vsel %vm220_vm14, %v223_v29, %v226_v27 }
  0x60   :  { %v124_v32 = vsel %vm114_vm15, nan, %v123_v30  ;;  %v228_v33 = vsel %vm114_vm15, nan, %v227_v31 }
  0x61   :  { %v229_v34 = vadd.f32 %v228_v33, %v124_v32 }
  0x63   :  { %230 = vst [vmem:[#allocation5] sm:$0xff] %v229_v34 }
  0x64   :  { %301 = shalt.err (!%p298_p9)
}
  0x65   :  { %240 = dma.vmem_to_hbm [thread:$0]  %s238_s11, 128, %s360_s1, [#allocation4]  }
  0x66   :  { %312 = dma.done.wait [#allocation4], 128  }
  0x67   :  { %313 = vsyncadd [#allocation4], 4294967168 }
  0x68   :  { %244 = vsyncpa [#allocation3], 1 }
  0x69   :  { %245 = vsyncpa [#allocation4], 1 }

// kernel: frefusion_forward.3
= control target key start
LH: loop header
LB: loop body
LE: loop exit
PB: predicated region body
PF: predicated region fallthrough
CT: control target
= control target key end

     0   :  { %s845_s24 = smov 0   ;;  %s847_s25 = smov 0   ;;  %s902_s0 = inlined_call_operand.vmem [shape: f32[2,4,256], index: 0, kind: input, shape index: {}]   ;;  %s903_s1 = inlined_call_operand.vmem [shape: f32[2,4,256], index: 1, kind: input, shape index: {}]   ;;  %s904_s2 = inlined_call_operand.vmem [shape: f32[4,4], index: 2, kind: input, shape index: {}]   ;;  %s905_s3 = inlined_call_operand.vmem [shape: f32[4,1], index: 3, kind: input, shape index: {}]   ;;  %s906_s4 = inlined_call_operand.vmem [shape: f32[4,4], index: 4, kind: input, shape index: {}]   ;;  %s907_s5 = inlined_call_operand.vmem [shape: f32[4,1], index: 5, kind: input, shape index: {}]   ;;  %s908_s6 = inlined_call_operand.vmem [shape: f32[2,4,256], index: 6, kind: output, shape index: {0}]   ;;  %s909_s7 = inlined_call_operand.vmem [shape: f32[2,4,256], index: 7, kind: output, shape index: {1}]  }
   0x1   :  { %s849_s26 = smov 0  }
   0x2 LB: > { %s30_s27 = sadd.s32 1, %s797_s25  ;;  %p729_p0 = scmp.ge.s32.totalorder %s801_s26, 1  ;;  %s801_s26 = sphi %s849_s26, %s18_s26   ;;  %s797_s25 = sphi %s847_s25, %s911_s25   ;;  %s793_s24 = sphi %s845_s24, %s910_s24  }
   0x3   : > { %p32_p1 = scmp.ge.s32.totalorder %s30_s27, 2  ;;  %p280_p2 = scmp.lt.s32.totalorder %s801_s26, 3 }
   0x5   : > { %s913_s27 = smov (%p32_p1, %s30_s27), 0  ;;  %p281_p3 = pnand %p729_p0, %p280_p2 }
   0x6   : > { %p339_p4 = scmp.lt.s32.totalorder (!%p281_p3), %s793_s24, 1 }
   0x7   : > { %284 = sbr.rel (%p281_p3) target bundleno = 223 (0xdf), region = 44 }
   0xc   : > { %v803_v0 = vmov 0.0   ;;  %v381_v1 = vld [vmem:[%s905_s3] sm:$0xf]  ;;  %s915_s24 = smov (!%p339_p4, %s793_s24), 1  ;;  %v804_v2 = vmov 0   ;;  %vm393_vm0 = vcmask 1043456  }
   0xd   : > { %462 = vmatprep.mubr.f32.mxu0 %v803_v0  ;;  %551 = vmatprep.mubr.f32.mxu1 %v803_v0  ;;  %s866_s30 = sshll.u32 %s915_s24, 3  ;;  %v472_v3 = vld [vmem:[%s907_s5] sm:$0xf]  ;;  %vm389_vm1 = vcmask 31744  }
   0xe   : > { %776 = vset.pattern.permute.xlu0 %v804_v2  ;;  %s346_s12 = scalar_lea.vmem %s902_s0, %s866_s30  ;;  %s356_s15 = scalar_lea.vmem %s903_s1, %s866_s30  ;;  %v380_v8 = vld [vmem:[%s904_s2] sm:$0xf] }
   0xf   : > { %384 = vperm.xlu0 %776, %v381_v1   ;;  %v378_v4 = vld [vmem:[%s346_s12] sm:$0xff]  ;;  %s366_s22 = scalar_lea.vmem %s908_s6, %s866_s30  ;;  %s376_s28 = scalar_lea.vmem %s909_s7, %s866_s30 }
  0x10   : > { %v379_v5 = vld [vmem:[%s356_s15] sm:$0xff]  ;;  %v388_v6 = vcombine.high %v378_v4, %v378_v4 }
  0x11   : > { %v479_v7 = vcombine.high %v379_v5, %v379_v5  ;;  %v471_v9 = vld [vmem:[%s906_s4] sm:$0xf] }
  0x12   : > { %738 = vmatprep.subr.msk.mxu0 %vm393_vm0, %v388_v6 }
  0x13   : > { %475 = vperm.xlu0 %776, %v472_v3   ;;  %741 = vmatprep.subr.msk.mxu1 %vm393_vm0, %v479_v7 }
  0x14   : > { %739 = vmatpush1.msk.msra.mxu0 %vm393_vm0, %v378_v4  ;;  %742 = vmatpush1.msk.msra.mxu1 %vm393_vm0, %v379_v5 }
  0x15   : > { %740 = vmatmul.mubr.msk.f32.vlgmr.msra.gmra.mxu0 %vm389_vm1, %v380_v8  ;;  %743 = vmatmul.mubr.msk.f32.vlgmr.msra.gmra.mxu1 %vm389_vm1, %v471_v9 }
  0x8a   : > { %v385_v10 = vpop.permute.xlu0 %384 }
  0x8e   : > { %v476_v11 = vpop.permute.xlu0 %475 }
  0xd5   : > { %v464_v12 = vpop.f32.mrf.mxu0  ;;  %v553_v13 = vpop.f32.mrf.mxu1 }
  0xd6   : > { %v465_v14 = vadd.f32 %v464_v12, %v385_v10  ;;  %v554_v15 = vadd.f32 %v553_v13, %v476_v11 }
  0xd7   : > { %v466_v16 = vpop.f32.mrf.mxu0  ;;  %v555_v17 = vpop.f32.mrf.mxu1 }
  0xd8   : > { %v467_v18 = vadd.f32 %v466_v16, %v385_v10  ;;  %v556_v19 = vadd.f32 %v555_v17, %v476_v11  ;;  %v469_v20 = vadd.f32 1e-08, %v465_v14  ;;  %v558_v21 = vadd.f32 1e-08, %v554_v15 }
  0xda   : > { %v470_v22 = vadd.f32 1e-08, %v467_v18  ;;  %v559_v23 = vadd.f32 1e-08, %v556_v19 }
  0xdc   : > { %v562_v24 = vcombine.low %v469_v20, %v470_v22  ;;  %v567_v25 = vcombine.low %v558_v21, %v559_v23 }
  0xde   : > { %564 = vst [vmem:[%s366_s22] sm:$0xff] %v562_v24  ;;  %569 = vst [vmem:[%s376_s28] sm:$0xff] %v567_v25 }
  0xdf PF: > { %s18_s26 = sadd.s32 1, %s801_s26   ;;  %s910_s24 = smov %s797_s25 }
  0xe0   : > { %p15_p5 = scmp.ge.s32.totalorder %s18_s26, 4   ;;  %s911_s25 = smov %s913_s27 }
  0xe2   :  { %17 = sbr.rel (!%p15_p5) target bundleno = 2 (0x2), region = 89 }

// kernel: frefusion_forward.4
= control target key start
LH: loop header
LB: loop body
LE: loop exit
PB: predicated region body
PF: predicated region fallthrough
CT: control target
= control target key end

     0   :  { %s1243_s27 = smov 0   ;;  %s1245_s28 = smov 0   ;;  %s1340_s0 = inlined_call_operand.vmem [shape: bf16[2,4,256], index: 0, kind: input, shape index: {}]   ;;  %s1341_s1 = inlined_call_operand.vmem [shape: bf16[2,4,256], index: 1, kind: input, shape index: {}]   ;;  %s1342_s2 = inlined_call_operand.vmem [shape: bf16[2,4,256], index: 2, kind: input, shape index: {}]   ;;  %s1343_s3 = inlined_call_operand.vmem [shape: f32[2,4,1], index: 3, kind: input, shape index: {}]   ;;  %s1344_s4 = inlined_call_operand.vmem [shape: f32[2,4,1], index: 4, kind: input, shape index: {}]   ;;  %s1345_s5 = inlined_call_operand.vmem [shape: f32[4,4,4], index: 5, kind: input, shape index: {}]   ;;  %s1346_s6 = inlined_call_operand.vmem [shape: f32[4,4,1], index: 6, kind: input, shape index: {}]   ;;  %s1347_s7 = inlined_call_operand.vmem [shape: bf16[2,4,256], index: 7, kind: output, shape index: {0}]   ;;  %s1348_s8 = inlined_call_operand.vmem [shape: bf16[2,4,256], index: 8, kind: output, shape index: {1}]  }
   0x1   :  { %s1247_s29 = smov 0  }
   0x2 LB: > { %s31_s30 = sadd.s32 1, %s1190_s28  ;;  %p1102_p0 = scmp.ge.s32.totalorder %s1194_s29, 1  ;;  %s1194_s29 = sphi %s1247_s29, %s19_s29   ;;  %s1190_s28 = sphi %s1245_s28, %s1350_s28   ;;  %s1186_s27 = sphi %s1243_s27, %s1349_s27  }
   0x3   : > { %p33_p1 = scmp.ge.s32.totalorder %s31_s30, 2  ;;  %p340_p2 = scmp.lt.s32.totalorder %s1194_s29, 3 }
   0x5   : > { %s1352_s30 = smov (%p33_p1, %s31_s30), 0  ;;  %p341_p3 = pnand %p1102_p0, %p340_p2 }
   0x6   : > { %p418_p4 = scmp.lt.s32.totalorder (!%p341_p3), %s1186_s27, 1 }
   0x7   : > { %344 = sbr.rel (%p341_p3) target bundleno = 552 (0x228), region = 48 }
   0xc   : > { %v1196_v0 = vmov 0   ;;  %v1197_v1 = vmov 0.0   ;;  %v506_v2 = vld [vmem:[%s1346_s6] sm:$0xf]  ;;  %s1354_s27 = smov (!%p418_p4, %s1186_s27), 1  ;;  %vm522_vm0 = vcmask 1043456  }
   0xd   : > { %1170 = vset.pattern.permute.xlu0 %v1196_v0  ;;  %591 = vmatprep.mubr.f32.mxu0 %v1197_v1  ;;  %s1266_s11 = sshll.u32 %s1354_s27, 2  ;;  %v505_v8 = vld [vmem:[%s1345_s5] sm:$0xf]  ;;  %vm518_vm1 = vcmask 31744   ;;  %v1116_v9 = vld [vmem:[%s1346_s6 + $0x4] sm:$0xf] }
   0xe   : > { %1171 = vset.pattern.permute.xlu1 %v1196_v0  ;;  %682 = vmatprep.mubr.f32.mxu1 %v1197_v1  ;;  %s450_s14 = scalar_lea.vmem %s1343_s3, %s1266_s11  ;;  %s454_s17 = scalar_lea.vmem %s1344_s4, %s1266_s11  ;;  %v1124_v10 = vld [vmem:[%s1346_s6 + $0x8] sm:$0xf]  ;;  %v1126_v11 = vld [vmem:[%s1346_s6 + $0xc] sm:$0xf]  ;;  %v1115_v36 = vld [vmem:[%s1345_s5 + $0x4] sm:$0xf] }
   0xf   : > { %513 = vperm.xlu1 %1171, %v506_v2   ;;  %v481_v3 = vld [vmem:[%s450_s14] sm:$0xf]  ;;  %s425_s20 = scalar_lea.vmem %s1340_s0, %s1266_s11  ;;  %s435_s13 = scalar_lea.vmem %s1341_s1, %s1266_s11  ;;  %v1123_v26 = vld [vmem:[%s1345_s5 + $0x8] sm:$0xf]  ;;  %v1125_v45 = vld [vmem:[%s1345_s5 + $0xc] sm:$0xf] }
  0x10   : > { %485 = vperm.xlu0 %1170, %v481_v3   ;;  %v475_v4 = vld [vmem:[%s425_s20] sm:$0xf]  ;;  %s445_s16 = scalar_lea.vmem %s1342_s2, %s1266_s11  ;;  %s463_s25 = scalar_lea.vmem %s1347_s7, %s1266_s11 }
  0x11   : > { %v482_v5 = vld [vmem:[%s454_s17] sm:$0xf]  ;;  %v476_v6 = vunpack.c.l.bf16 %v475_v4  ;;  %s473_s9 = scalar_lea.vmem %s1348_s8, %s1266_s11 }
  0x12   : > { %v477_v12 = vld [vmem:[%s435_s13] sm:$0xf] }
  0x13   : > { %v517_v7 = vcombine.high %v476_v6, %v476_v6  ;;  %699 = vperm.xlu1 %1171, %v1124_v10   ;;  %v479_v13 = vld [vmem:[%s445_s16] sm:$0xf]  ;;  %v478_v14 = vunpack.c.l.bf16 %v477_v12 }
  0x14   : > { %495 = vperm.xlu0 %1170, %v482_v5   ;;  %v480_v15 = vunpack.c.l.bf16 %v479_v13 }
  0x15   : > { %1117 = vmatprep.subr.msk.mxu0 %vm522_vm0, %v517_v7  ;;  %v489_v17 = vcombine.high %v478_v14, %v478_v14 }
  0x16   : > { %1118 = vmatpush1.msk.msra.mxu0 %vm522_vm0, %v476_v6  ;;  %v499_v18 = vcombine.high %v480_v15, %v480_v15 }
  0x17   : > { %1119 = vmatmul.mubr.msk.f32.vlgmr.msra.gmra.mxu0 %vm518_vm1, %v505_v8  ;;  %790 = vperm.xlu1 %1171, %v1126_v11  }
  0x18   : > { %606 = vperm.xlu0 %1170, %v1116_v9   ;;  %775 = vmatprep.mubr.f32.mxu0 %v1197_v1 }
  0x8a   : > { %v514_v27 = vpop.permute.xlu1 %513 }
  0x8b   : > { %v486_v16 = vpop.permute.xlu0 %485 }
  0x8c   : > { %v491_v20 = vmul.f32 %v486_v16, %v478_v14  ;;  %v492_v21 = vmul.f32 %v489_v17, %v486_v16 }
  0x8e   : > { %v700_v37 = vpop.permute.xlu1 %699 }
  0x8f   : > { %v496_v19 = vpop.permute.xlu0 %495 }
  0x90   : > { %v501_v22 = vmul.f32 %v496_v19, %v480_v15  ;;  %v502_v23 = vmul.f32 %v499_v18, %v496_v19 }
  0x92   : > { %v503_v24 = vadd.f32 %v501_v22, %v491_v20  ;;  %v504_v25 = vadd.f32 %v502_v23, %v492_v21  ;;  %v791_v54 = vpop.permute.xlu1 %790 }
  0x93   : > { %v607_v48 = vpop.permute.xlu0 %606 }
  0x94   : > { %1127 = vmatprep.subr.msk.mxu0 %vm522_vm0, %v504_v25 }
  0x95   : > { %1128 = vmatpush1.msk.msra.mxu0 %vm522_vm0, %v503_v24 }
  0x96   : > { %1129 = vmatmul.mubr.msk.f32.vlgmr.msra.gmra.mxu0 %vm518_vm1, %v1123_v26 }
  0xd7   : > { %v593_v28 = vpop.f32.mrf.mxu0 }
  0xd8   : > { %v594_v29 = vadd.f32 %v593_v28, %v514_v27 }
  0xd9   : > { %v595_v30 = vpop.f32.mrf.mxu0 }
  0xda   : > { %v596_v31 = vadd.f32 %v595_v30, %v514_v27  ;;  %vm598_vm2 = vcmp.gt.f32.partialorder %v594_v29, 0.0  ;;  %v600_v32 = vmul.f32 0.1, %v594_v29 }
  0xdc   : > { %vm599_vm3 = vcmp.gt.f32.partialorder %v596_v31, 0.0  ;;  %v601_v33 = vmul.f32 0.1, %v596_v31  ;;  %v602_v34 = vsel %vm598_vm2, %v594_v29, %v600_v32 }
  0xde   : > { %v603_v35 = vsel %vm599_vm3, %v596_v31, %v601_v33 }
  0xdf   : > { %1120 = vmatprep.subr.msk.mxu1 %vm522_vm0, %v603_v35 }
  0xe0   : > { %1121 = vmatpush1.msk.msra.mxu1 %vm522_vm0, %v602_v34 }
  0xe1   : > { %1122 = vmatmul.mubr.msk.f32.vlgmr.msra.gmra.mxu1 %vm518_vm1, %v1115_v36 }
  0xe2   : > { %866 = vmatprep.mubr.f32.mxu1 %v1197_v1 }
 0x156   : > { %v777_v38 = vpop.f32.mrf.mxu0 }
 0x157   : > { %v778_v39 = vadd.f32 %v777_v38, %v700_v37 }
 0x158   : > { %v779_v40 = vpop.f32.mrf.mxu0 }
 0x159   : > { %v780_v41 = vadd.f32 %v779_v40, %v700_v37  ;;  %v784_v42 = vmul.f32 0.1, %v778_v39  ;;  %vm782_vm4 = vcmp.gt.f32.partialorder %v778_v39, 0.0 }
 0x15b   : > { %vm783_vm5 = vcmp.gt.f32.partialorder %v780_v41, 0.0  ;;  %v785_v43 = vmul.f32 0.1, %v780_v41  ;;  %v786_v46 = vsel %vm782_vm4, %v778_v39, %v784_v42 }
 0x15d   : > { %v787_v44 = vsel %vm783_vm5, %v780_v41, %v785_v43 }
 0x15e   : > { %1130 = vmatprep.subr.msk.mxu1 %vm522_vm0, %v787_v44 }
 0x15f   : > { %1131 = vmatpush1.msk.msra.mxu1 %vm522_vm0, %v786_v46 }
 0x160   : > { %1132 = vmatmul.mubr.msk.f32.vlgmr.msra.gmra.mxu1 %vm518_vm1, %v1125_v45 }
 0x1a1   : > { %v684_v47 = vpop.f32.mrf.mxu1 }
 0x1a2   : > { %v685_v50 = vadd.f32 %v684_v47, %v607_v48 }
 0x1a3   : > { %v686_v49 = vpop.f32.mrf.mxu1 }
 0x1a4   : > { %v687_v51 = vadd.f32 %v686_v49, %v607_v48 }
 0x1a6   : > { %v1133_v52 = vpack.c.bf16 %v687_v51, %v685_v50 }
 0x1a8   : > { %1134 = vst.sshfl [vmem:[%s463_s25] sm:$0x33 pattern:$0x76325410] %v1133_v52 }
 0x220   : > { %v868_v53 = vpop.f32.mrf.mxu1 }
 0x221   : > { %v869_v56 = vadd.f32 %v868_v53, %v791_v54 }
 0x222   : > { %v870_v55 = vpop.f32.mrf.mxu1 }
 0x223   : > { %v871_v57 = vadd.f32 %v870_v55, %v791_v54 }
 0x225   : > { %v1135_v58 = vpack.c.bf16 %v871_v57, %v869_v56 }
 0x227   : > { %1136 = vst.sshfl [vmem:[%s473_s9] sm:$0x33 pattern:$0x76325410] %v1135_v58 }
 0x228 PF: > { %s19_s29 = sadd.s32 1, %s1194_s29   ;;  %s1349_s27 = smov %s1190_s28 }
 0x229   : > { %p16_p5 = scmp.ge.s32.totalorder %s19_s29, 4   ;;  %s1350_s28 = smov %s1352_s30 }
 0x22b   :  { %18 = sbr.rel (!%p16_p5) target bundleno = 2 (0x2), region = 108 }

// kernel: reverse.0
= control target key start
LH: loop header
LB: loop body
LE: loop exit
PB: predicated region body
PF: predicated region fallthrough
CT: control target
= control target key end

     0   :  { %v72_v3 = vlaneseq  ;;  %v65_v9 = vld [vmem:[#allocation0 + $0x7] ss:$-1 sm:$0xff]  ;;  %v79_v12 = vld [vmem:[#allocation0 + $0x17] ss:$-1 sm:$0xff]  ;;  %s331_s0 = inlined_call_operand.vmem [shape: f32[2,4,16,7], index: 0, kind: input, shape index: {}]   ;;  %s332_s1 = inlined_call_operand.vmem [shape: f32[2,4,16,7], index: 1, kind: output, shape index: {}]  }
   0x1   :  { %v45_v0 = vld [vmem:[%s331_s0] sm:$0xff]  ;;  %v47_v1 = vld [vmem:[%s331_s0 + $0x8] sm:$0xff]  ;;  %v49_v2 = vld [vmem:[%s331_s0 + $0x10] sm:$0xff]  ;;  %v66_v10 = vrot.slane %v65_v9, 1  ;;  %v80_v14 = vrot.slane %v79_v12, 1 }
   0x2   :  { %46 = vst [vmem:[#allocation0 + $0x8] sm:$0xff] %v45_v0  ;;  %48 = vst [vmem:[#allocation0 + $0x18] sm:$0xff] %v47_v1  ;;  %v51_v4 = vld [vmem:[%s331_s0 + $0x18] sm:$0xff]  ;;  %v53_v5 = vld [vmem:[%s331_s0 + $0x20] sm:$0xff]  ;;  %v73_v11 = vshrl.u32 %v72_v3, 7 }
   0x3   :  { %50 = vst [vmem:[#allocation0 + $0x28] sm:$0xff] %v49_v2  ;;  %v55_v6 = vld [vmem:[%s331_s0 + $0x28] sm:$0xff]  ;;  %52 = vst [vmem:[#allocation0 + $0x38] sm:$0xff] %v51_v4  ;;  %v57_v7 = vld [vmem:[%s331_s0 + $0x30] sm:$0xff] }
   0x4   :  { %54 = vst [vmem:[#allocation0 + $0x48] sm:$0xff] %v53_v5  ;;  %56 = vst [vmem:[#allocation0 + $0x58] sm:$0xff] %v55_v6  ;;  %v59_v8 = vld [vmem:[%s331_s0 + $0x38] sm:$0xff]  ;;  %v93_v13 = vld [vmem:[#allocation0 + $0x27] ss:$-1 sm:$0xff]  ;;  %vm74_vm0 = vcmp.lt.s32.totalorder %v73_v11, 7 }
   0x5   :  { %58 = vst [vmem:[#allocation0 + $0x68] sm:$0xff] %v57_v7  ;;  %60 = vst [vmem:[#allocation0 + $0x78] sm:$0xff] %v59_v8  ;;  %v94_v15 = vrot.slane %v93_v13, 1  ;;  %v107_v16 = vld [vmem:[#allocation0 + $0x37] ss:$-1 sm:$0xff] }
   0x6   :  { %67 = vst [vmem:[#allocation1] sm:$0xff] %v66_v10  ;;  %v108_v17 = vrot.slane %v107_v16, 1  ;;  %v121_v18 = vld [vmem:[#allocation0 + $0x47] ss:$-1 sm:$0xff]  ;;  %v135_v19 = vld [vmem:[#allocation0 + $0x57] ss:$-1 sm:$0xff] }
   0x7   :  { %81 = vst [vmem:[#allocation1 + $0x8] sm:$0xff] %v80_v14  ;;  %95 = vst [vmem:[#allocation1 + $0x10] sm:$0xff] %v94_v15  ;;  %v122_v20 = vrot.slane %v121_v18, 1  ;;  %v136_v21 = vrot.slane %v135_v19, 1  ;;  %v149_v22 = vld [vmem:[#allocation0 + $0x67] ss:$-1 sm:$0xff] }
   0x8   :  { %v163_v23 = vld [vmem:[#allocation0 + $0x77] ss:$-1 sm:$0xff]  ;;  %109 = vst [vmem:[#allocation1 + $0x18] sm:$0xff] %v108_v17  ;;  %v150_v24 = vrot.slane %v149_v22, 1 }
   0x9   :  { %v164_v25 = vrot.slane %v163_v23, 1  ;;  %v70_v26 = vld [vmem:[#allocation0 + $0xf] ss:$-1 sm:$0xff]  ;;  %v84_v27 = vld [vmem:[#allocation0 + $0x1f] ss:$-1 sm:$0xff]  ;;  %123 = vst [vmem:[#allocation1 + $0x20] sm:$0xff] %v122_v20 }
   0xa   :  { %v98_v28 = vld [vmem:[#allocation0 + $0x2f] ss:$-1 sm:$0xff]  ;;  %137 = vst [vmem:[#allocation1 + $0x28] sm:$0xff] %v136_v21  ;;  %v71_v29 = vrot.slane %v70_v26, 1  ;;  %v85_v30 = vrot.slane %v84_v27, 1  ;;  %151 = vst [vmem:[#allocation1 + $0x30] sm:$0xff] %v150_v24 }
   0xb   :  { %v99_v31 = vrot.slane %v98_v28, 1  ;;  %v112_v32 = vld [vmem:[#allocation0 + $0x3f] ss:$-1 sm:$0xff]  ;;  %165 = vst [vmem:[#allocation1 + $0x38] sm:$0xff] %v164_v25  ;;  %v126_v34 = vld [vmem:[#allocation0 + $0x4f] ss:$-1 sm:$0xff] }
   0xc   :  { %v113_v33 = vrot.slane %v112_v32, 1  ;;  %v140_v35 = vld [vmem:[#allocation0 + $0x5f] ss:$-1 sm:$0xff]  ;;  %75 = vst.msk [vmem:[#allocation1] sm:$0xff] %vm74_vm0, %v71_v29  ;;  %89 = vst.msk [vmem:[#allocation1 + $0x8] sm:$0xff] %vm74_vm0, %v85_v30  ;;  %v127_v36 = vrot.slane %v126_v34, 1 }
   0xd   :  { %103 = vst.msk [vmem:[#allocation1 + $0x10] sm:$0xff] %vm74_vm0, %v99_v31  ;;  %v141_v37 = vrot.slane %v140_v35, 1  ;;  %v154_v38 = vld [vmem:[#allocation0 + $0x6f] ss:$-1 sm:$0xff]  ;;  %v168_v39 = vld [vmem:[#allocation0 + $0x7f] ss:$-1 sm:$0xff] }
   0xe   :  { %117 = vst.msk [vmem:[#allocation1 + $0x18] sm:$0xff] %vm74_vm0, %v113_v33  ;;  %v155_v40 = vrot.slane %v154_v38, 1  ;;  %v169_v41 = vrot.slane %v168_v39, 1  ;;  %131 = vst.msk [vmem:[#allocation1 + $0x20] sm:$0xff] %vm74_vm0, %v127_v36 }
   0xf   :  { %145 = vst.msk [vmem:[#allocation1 + $0x28] sm:$0xff] %vm74_vm0, %v141_v37 }
  0x10   :  { %159 = vst.msk [vmem:[#allocation1 + $0x30] sm:$0xff] %vm74_vm0, %v155_v40  ;;  %173 = vst.msk [vmem:[#allocation1 + $0x38] sm:$0xff] %vm74_vm0, %v169_v41 }
  0x13   :  { %v216_v42 = vld [vmem:[#allocation1] sm:$0xff]  ;;  %v218_v43 = vld [vmem:[#allocation1 + $0x8] sm:$0xff] }
  0x14   :  { %v220_v44 = vld [vmem:[#allocation1 + $0x10] sm:$0xff]  ;;  %217 = vst [vmem:[%s332_s1] sm:$0xff] %v216_v42  ;;  %219 = vst [vmem:[%s332_s1 + $0x8] sm:$0xff] %v218_v43 }
  0x15   :  { %221 = vst [vmem:[%s332_s1 + $0x10] sm:$0xff] %v220_v44  ;;  %v222_v45 = vld [vmem:[#allocation1 + $0x18] sm:$0xff]  ;;  %v224_v46 = vld [vmem:[#allocation1 + $0x20] sm:$0xff] }
  0x16   :  { %223 = vst [vmem:[%s332_s1 + $0x18] sm:$0xff] %v222_v45  ;;  %v226_v47 = vld [vmem:[#allocation1 + $0x28] sm:$0xff]  ;;  %225 = vst [vmem:[%s332_s1 + $0x20] sm:$0xff] %v224_v46 }
  0x17   :  { %227 = vst [vmem:[%s332_s1 + $0x28] sm:$0xff] %v226_v47  ;;  %v228_v48 = vld [vmem:[#allocation1 + $0x30] sm:$0xff]  ;;  %v230_v49 = vld [vmem:[#allocation1 + $0x38] sm:$0xff] }
  0x18   :  { %229 = vst [vmem:[%s332_s1 + $0x30] sm:$0xff] %v228_v48  ;;  %231 = vst [vmem:[%s332_s1 + $0x38] sm:$0xff] %v230_v49 }

// kernel: frefusion_forward.5
= control target key start
LH: loop header
LB: loop body
LE: loop exit
PB: predicated region body
PF: predicated region fallthrough
CT: control target
= control target key end

     0   :  { %s482_s12 = smov 0   ;;  %s484_s13 = smov 0   ;;  %s521_s0 = inlined_call_operand.vmem [shape: f32[2,4,256], index: 0, kind: input, shape index: {}]   ;;  %s522_s1 = inlined_call_operand.vmem [shape: f32[4,4], index: 1, kind: input, shape index: {}]   ;;  %s523_s2 = inlined_call_operand.vmem [shape: f32[4,1], index: 2, kind: input, shape index: {}]   ;;  %s524_s3 = inlined_call_operand.vmem [shape: f32[2,4,256], index: 3, kind: output, shape index: {}]  }
   0x1   :  { %s486_s14 = smov 0  }
   0x2 LB: > { %s25_s15 = sadd.s32 1, %s454_s13  ;;  %p397_p0 = scmp.ge.s32.totalorder %s458_s14, 1  ;;  %s458_s14 = sphi %s486_s14, %s13_s14   ;;  %s454_s13 = sphi %s484_s13, %s526_s13   ;;  %s450_s12 = sphi %s482_s12, %s525_s12  }
   0x3   : > { %p27_p1 = scmp.ge.s32.totalorder %s25_s15, 2  ;;  %p158_p2 = scmp.lt.s32.totalorder %s458_s14, 3 }
   0x5   : > { %s528_s15 = smov (%p27_p1, %s25_s15), 0  ;;  %p159_p3 = pnand %p397_p0, %p158_p2 }
   0x6   : > { %p191_p4 = scmp.lt.s32.totalorder (!%p159_p3), %s450_s12, 1 }
   0x7   : > { %162 = sbr.rel (%p159_p3) target bundleno = 222 (0xde), region = 32 }
   0xc   : > { %v460_v0 = vmov 0.0   ;;  %v213_v1 = vld [vmem:[%s523_s2] sm:$0xf]  ;;  %s530_s12 = smov (!%p191_p4, %s450_s12), 1  ;;  %v461_v2 = vmov 0   ;;  %vm225_vm0 = vcmask 1043456  }
   0xd   : > { %294 = vmatprep.mubr.f32.mxu0 %v460_v0  ;;  %435 = vset.pattern.permute.xlu0 %v461_v2  ;;  %s407_s18 = sshll.u32 %s530_s12, 3  ;;  %v212_v6 = vld [vmem:[%s522_s1] sm:$0xf]  ;;  %vm221_vm1 = vcmask 31744  }
   0xe   : > { %216 = vperm.xlu0 %435, %v213_v1   ;;  %s198_s21 = scalar_lea.vmem %s521_s0, %s407_s18  ;;  %s208_s26 = scalar_lea.vmem %s524_s3, %s407_s18 }
   0xf   : > { %v210_v3 = vld [vmem:[%s198_s21] sm:$0xff] }
  0x10   : > { %v211_v4 = vand.u32 2147483647, %v210_v3 }
  0x12   : > { %v220_v5 = vcombine.high %v211_v4, %v211_v4 }
  0x14   : > { %402 = vmatprep.subr.msk.mxu0 %vm225_vm0, %v220_v5 }
  0x15   : > { %403 = vmatpush1.msk.msra.mxu0 %vm225_vm0, %v211_v4 }
  0x16   : > { %404 = vmatmul.mubr.msk.f32.vlgmr.msra.gmra.mxu0 %vm221_vm1, %v212_v6 }
  0x89   : > { %v217_v7 = vpop.permute.xlu0 %216 }
  0xd6   : > { %v296_v8 = vpop.f32.mrf.mxu0 }
  0xd7   : > { %v297_v10 = vadd.f32 %v296_v8, %v217_v7 }
  0xd8   : > { %v298_v9 = vpop.f32.mrf.mxu0 }
  0xd9   : > { %v299_v11 = vadd.f32 %v298_v9, %v217_v7 }
  0xdb   : > { %v303_v12 = vcombine.low %v297_v10, %v299_v11 }
  0xdd   : > { %305 = vst [vmem:[%s208_s26] sm:$0xff] %v303_v12 }
  0xde PF: > { %s13_s14 = sadd.s32 1, %s458_s14   ;;  %s525_s12 = smov %s454_s13 }
  0xdf   : > { %p10_p5 = scmp.ge.s32.totalorder %s13_s14, 4   ;;  %s526_s13 = smov %s528_s15 }
  0xe1   :  { %12 = sbr.rel (!%p10_p5) target bundleno = 2 (0x2), region = 62 }

</bundles_post_ra>
